<compile_context>
chip_gen: v5e
topology: v5e:2x2
jax: 0.10.0
libtpu: 0.0.40
codegen_flags: <defaults>
</compile_context>

<pallas_src>
import jax
import jax.numpy as jnp
from jax.experimental import pallas as pl
from jax.experimental.pallas import tpu as pltpu


# ----------------------------------------------------------------------------- helpers
def _round_up(x, m):
    return -(-x // m) * m


def _vmem_capacity_bytes():
    try:
        return int(pltpu.get_tpu_info().vmem_capacity_bytes)
    except Exception:
        # Conservative fallback: 64 MiB is a correct lower bound for all current gens.
        return 64 * 1024 * 1024


def _choose_c_blk(n_cls, n_ctx, suf_len, d, itemsize, vmem_cap):
    """Pick the number of classes handled per grid step (multiple of 8)."""
    s = 1 + n_ctx + suf_len
    if vmem_cap <= 64 * 1024 * 1024:      # v7x-class TensorCore: 64 MiB physical VMEM
        budget = 20 * 1024 * 1024
    else:                                  # v5e / v6e: 128 MiB physical VMEM
        budget = 64 * 1024 * 1024
    # Double-buffered per-class resident bytes, including sublane padding of the
    # (token, D) tiles: out block (S), suffix block (suf_len), dense prefix row (1).
    per_class = 2 * (_round_up(s, 8) + _round_up(suf_len, 8) + 1) * d * itemsize
    fixed = 2 * _round_up(n_ctx, 8) * d * itemsize    # resident shared ctx block
    cap = max(1, (budget - fixed) // per_class)
    cap = min(cap, n_cls, 1024)
    if n_cls >= 16:
        # Keep at least 2 grid steps so the "parallel" class axis can shard across
        # both TensorCores on v7x (a no-op on single-TC v5e/v6e).
        cap = min(cap, _round_up(-(-n_cls // 2), 8))
    c_blk = (cap // 8) * 8 if cap >= 8 else cap
    return max(1, c_blk)


# ------------------------------------------------------------ faithful forward kernel
def _prompt_assemble_kernel(prefix_ref, ctx_ref, suffix_ref, out_ref):
    # prefix_ref: (c_blk, D)          -- SOS-token embeddings (dense, squeezed)
    # ctx_ref:    (n_ctx, D)          -- shared learned context (same block every step)
    # suffix_ref: (c_blk, suf_len, D) -- class-name + EOS embeddings
    # out_ref:    (c_blk, S, D)       -- assembled prompts for this class block
    c_blk = suffix_ref.shape[0]
    n_ctx, d = ctx_ref.shape
    # Three direct sub-view stores into the pipelined output block (no concat slab).
    out_ref[:, 0, :] = prefix_ref[...]
    out_ref[:, 1:1 + n_ctx, :] = jnp.broadcast_to(
        ctx_ref[...][None, :, :], (c_blk, n_ctx, d))
    out_ref[:, 1 + n_ctx:, :] = suffix_ref[...]


def prompt_learner_forward(token_prefix, ctx, token_suffix):
    """Faithful CoOp PromptLearner.forward (class_token_position == 'end').

    token_prefix: (n_cls, 1, D), ctx: (n_ctx, D), token_suffix: (n_cls, suf_len, D)
    returns prompts: (n_cls, 1 + n_ctx + suf_len, D)
    """
    n_cls, _, d = token_prefix.shape
    n_ctx = ctx.shape[0]
    suf_len = token_suffix.shape[1]
    s = 1 + n_ctx + suf_len
    dtype = token_prefix.dtype
    itemsize = dtype.itemsize

    # Single dtype end-to-end (matches CoOp's .type(dtype)); cast in the wrapper.
    ctx = ctx.astype(dtype)
    # Squeeze the size-1 token dim -> dense (c_blk, D) blocks, no sublane padding.
    prefix2d = token_prefix.reshape(n_cls, d)

    vmem_cap = _vmem_capacity_bytes()
    c_blk = _choose_c_blk(n_cls, n_ctx, suf_len, d, itemsize, vmem_cap)
    grid = (pl.cdiv(n_cls, c_blk),)        # partial last block handled by masking

    bytes_accessed = itemsize * (prefix2d.size + ctx.size + token_suffix.size
                                 + n_cls * s * d)
    cost = pl.CostEstimate(flops=0, transcendentals=0, bytes_accessed=bytes_accessed)
    vmem_limit = (56 * 1024 * 1024 if vmem_cap <= 64 * 1024 * 1024
                  else 100 * 1024 * 1024)

    return pl.pallas_call(
        _prompt_assemble_kernel,
        out_shape=jax.ShapeDtypeStruct((n_cls, s, d), dtype),
        grid=grid,
        in_specs=[
            pl.BlockSpec((c_blk, d), lambda i: (i, 0)),              # prefix (dense)
            pl.BlockSpec((n_ctx, d), lambda i: (0, 0)),              # shared ctx, resident
            pl.BlockSpec((c_blk, suf_len, d), lambda i: (i, 0, 0)),  # suffix block
        ],
        out_specs=pl.BlockSpec((c_blk, s, d), lambda i: (i, 0, 0)),
        compiler_params=pltpu.CompilerParams(
            dimension_semantics=("parallel",),
            vmem_limit_bytes=vmem_limit,
        ),
        cost_estimate=cost,
    )(prefix2d, ctx, token_suffix)


# --------------------------------------------- aliased, ctx-band-only in-place kernel
def _ctx_band_inplace_kernel(ctx_ref, base_hbm_ref, out_hbm_ref, band_vmem, sems):
    # ctx_ref:      (n_ctx, D) in VMEM
    # base_hbm_ref: (n_cls, S, D) in HBM, aliased to out_hbm_ref (prefix/suffix kept)
    # out_hbm_ref:  (n_cls, S, D) in HBM -- only the ctx band [1, 1+n_ctx) is written
    # band_vmem:    (c_blk, n_ctx, D) VMEM source, filled once and reused
    del base_hbm_ref  # aliased; never read
    c_blk, n_ctx, d = band_vmem.shape
    n_cls = out_hbm_ref.shape[0]
    n_full = n_cls // c_blk
    rem = n_cls % c_blk

    band_vmem[...] = jnp.broadcast_to(ctx_ref[...][None, :, :], (c_blk, n_ctx, d))

    def block_copy(b, slot):
        return pltpu.make_async_copy(
            band_vmem,
            out_hbm_ref.at[pl.ds(b * c_blk, c_blk), pl.ds(1, n_ctx), :],
            sems.at[slot])

    block_copy(0, 0).start()

    @pl.loop(0, n_full)
    def _(b):
        slot = b & 1

        @pl.when(b + 1 < n_full)
        def _():
            block_copy(b + 1, 1 - slot).start()   # keep one DMA in flight

        block_copy(b, slot).wait()

    if rem:  # static tail copy (trace-time size) for non-divisible n_cls
        tail = pltpu.make_async_copy(
            band_vmem.at[pl.ds(0, rem)],
            out_hbm_ref.at[pl.ds(n_full * c_blk, rem), pl.ds(1, n_ctx), :],
            sems.at[0])
        tail.start()
        tail.wait()


def prompt_learner_forward_inplace(prompt_base, ctx):
    """Training-loop optimized variant: the module keeps the full (n_cls, S, D)
    token-embedding buffer (prefix + placeholder ctx + suffix); each forward only
    rewrites the ctx band in place (buffer aliased to the output)."""
    n_cls, s, d = prompt_base.shape
    n_ctx = ctx.shape[0]
    dtype = prompt_base.dtype
    ctx = ctx.astype(dtype)
    itemsize = dtype.itemsize

    # One small resident VMEM source band, reused for every class block.
    band_budget = 4 * 1024 * 1024
    cap = max(1, band_budget // (_round_up(n_ctx, 8) * d * itemsize))
    cap = min(cap, n_cls)
    c_blk = (cap // 8) * 8 if cap >= 8 else cap

    bytes_accessed = itemsize * (ctx.size + n_cls * n_ctx * d)
    cost = pl.CostEstimate(flops=0, transcendentals=0, bytes_accessed=bytes_accessed)

    return pl.pallas_call(
        _ctx_band_inplace_kernel,
        out_shape=jax.ShapeDtypeStruct((n_cls, s, d), dtype),
        grid=(1,),
        in_specs=[
            pl.BlockSpec((n_ctx, d), lambda i: (0, 0)),   # ctx in VMEM
            pl.BlockSpec(memory_space=pl.ANY),            # full prompt buffer stays in HBM
        ],
        out_specs=pl.BlockSpec(memory_space=pl.ANY),
        scratch_shapes=[
            pltpu.VMEM((c_blk, n_ctx, d), dtype),
            pltpu.SemaphoreType.DMA((2,)),
        ],
        input_output_aliases={1: 0},
        compiler_params=pltpu.CompilerParams(
            dimension_semantics=("arbitrary",),
            vmem_limit_bytes=32 * 1024 * 1024,
        ),
        cost_estimate=cost,
    )(ctx, prompt_base)


# ----------------------------------------------------------------------------- demo
if __name__ == "__main__":
    # Small, CLIP-like shapes (generic context, class_token_position == "end").
    n_cls = 10     # deliberately NOT a multiple of 8: exercises the cdiv / masked-tail path
    n_ctx = 8      # cfg.TRAINER.COOP.N_CTX
    ctx_dim = 128  # clip_model.ln_final.weight.shape[0]
    seq_len = 16   # tokenized prompt length (stand-in for CLIP's 77)
    suf_len = seq_len - 1 - n_ctx
    dtype = jnp.float32

    key = jax.random.PRNGKey(0)
    k_ctx, k_emb = jax.random.split(key)

    # Learned generic context vectors: normal(std=0.02), shape (n_ctx, ctx_dim).
    ctx = (0.02 * jax.random.normal(k_ctx, (n_ctx, ctx_dim))).astype(dtype)

    # Deterministic stand-in for clip_model.token_embedding(tokenized_prompts):
    # (n_cls, seq_len, ctx_dim); registered buffers are its prefix/suffix slices.
    embedding = jax.random.normal(k_emb, (n_cls, seq_len, ctx_dim)).astype(dtype)
    token_prefix = embedding[:, :1, :]            # buffer 'token_prefix'
    token_suffix = embedding[:, 1 + n_ctx:, :]    # buffer 'token_suffix'

    # Reference (plain JAX) forward semantics.
    ctx_expanded = jnp.broadcast_to(ctx[None, :, :], (n_cls, n_ctx, ctx_dim))
    ref = jnp.concatenate([token_prefix, ctx_expanded, token_suffix], axis=1)

    # 1) Faithful forward from the registered prefix/suffix buffers.
    prompts = prompt_learner_forward(token_prefix, ctx, token_suffix)
    prompts = jax.block_until_ready(prompts)
    assert prompts.shape == (n_cls, seq_len, ctx_dim)
    assert prompts.dtype == dtype
    assert jnp.array_equal(prompts, ref)

    # 2) In-place / aliased variant: module keeps the full embedding buffer, forward
    #    only rewrites the ctx band (~8x less HBM traffic for CLIP shapes).
    prompts2 = prompt_learner_forward_inplace(embedding, ctx)
    prompts2 = jax.block_until_ready(prompts2)
    assert prompts2.shape == (n_cls, seq_len, ctx_dim)
    assert jnp.array_equal(prompts2, ref)

    print("KERNEL_OK")
</pallas_src>

<mosaic_0001>
module attributes {stable_mosaic.version = 11 : i64} {
  func.func @_prompt_assemble_kernel(%arg0: i32, %arg1: memref<8x128xf32, #tpu.memory_space<vmem>>, %arg2: memref<8x128xf32, #tpu.memory_space<vmem>>, %arg3: memref<8x7x128xf32, #tpu.memory_space<vmem>>, %arg4: memref<8x16x128xf32, #tpu.memory_space<vmem>>) attributes {dimension_semantics = [#tpu.dimension_semantics<parallel>], iteration_bounds = array<i64: 2>, scalar_prefetch = 0 : i64, scratch_operands = 0 : i64, tpu.core_type = #tpu.core_type<tc>, window_params = [{transform_indices = @transform_0, window_bounds = array<i64: 8, 128>}, {pipeline_mode = #tpu.pipeline_mode<synchronous>, transform_indices = @transform_1, window_bounds = array<i64: 8, 128>}, {transform_indices = @transform_2, window_bounds = array<i64: 8, 7, 128>}, {transform_indices = @transform_3, window_bounds = array<i64: 8, 16, 128>}]} {
    %c0 = arith.constant 0 : index
    %c0_0 = arith.constant 0 : index
    %0 = vector.load %arg1[%c0, %c0_0] : memref<8x128xf32, #tpu.memory_space<vmem>>, vector<8x128xf32>
    %c0_1 = arith.constant 0 : index
    %c0_2 = arith.constant 0 : index
    %c0_3 = arith.constant 0 : index
    %1 = vector.load %arg4[%c0_1, %c0_2, %c0_3] : memref<8x16x128xf32, #tpu.memory_space<vmem>>, vector<8x1x128xf32>
    %2 = vector.shape_cast %1 : vector<8x1x128xf32> to vector<8x128xf32>
    %3 = vector.shape_cast %0 : vector<8x128xf32> to vector<8x1x128xf32>
    tpu.vector_store %arg4[%c0_1, %c0_2, %c0_3], %3 {strides = array<i32>} : memref<8x16x128xf32, #tpu.memory_space<vmem>>, vector<8x1x128xf32>,
    %c0_4 = arith.constant 0 : index
    %c0_5 = arith.constant 0 : index
    %4 = vector.load %arg2[%c0_4, %c0_5] : memref<8x128xf32, #tpu.memory_space<vmem>>, vector<8x128xf32>
    %5 = vector.shape_cast %4 : vector<8x128xf32> to vector<1x8x128xf32>
    %6 = vector.shape_cast %5 : vector<1x8x128xf32> to vector<1x8x128xf32>
    %7 = vector.broadcast %6 : vector<1x8x128xf32> to vector<8x8x128xf32>
    %c0_6 = arith.constant 0 : index
    %c1 = arith.constant 1 : index
    %c0_7 = arith.constant 0 : index
    %8 = vector.load %arg4[%c0_6, %c1, %c0_7] : memref<8x16x128xf32, #tpu.memory_space<vmem>>, vector<8x8x128xf32>
    tpu.vector_store %arg4[%c0_6, %c1, %c0_7], %7 {strides = array<i32>} : memref<8x16x128xf32, #tpu.memory_space<vmem>>, vector<8x8x128xf32>,
    %c0_8 = arith.constant 0 : index
    %c0_9 = arith.constant 0 : index
    %c0_10 = arith.constant 0 : index
    %9 = vector.load %arg3[%c0_8, %c0_9, %c0_10] : memref<8x7x128xf32, #tpu.memory_space<vmem>>, vector<8x7x128xf32>
    %c0_11 = arith.constant 0 : index
    %c9 = arith.constant 9 : index
    %c0_12 = arith.constant 0 : index
    %10 = vector.load %arg4[%c0_11, %c9, %c0_12] : memref<8x16x128xf32, #tpu.memory_space<vmem>>, vector<8x7x128xf32>
    tpu.vector_store %arg4[%c0_11, %c9, %c0_12], %9 {strides = array<i32>} : memref<8x16x128xf32, #tpu.memory_space<vmem>>, vector<8x7x128xf32>,
    return
  }
  func.func @transform_0(%arg0: i32) -> (i32, i32) {
    %c0_i32 = arith.constant 0 : i32
    %c0_i32_0 = arith.constant 0 : i32
    return %arg0, %c0_i32 : i32, i32
  }
  func.func @transform_1(%arg0: i32) -> (i32, i32) {
    %c0_i32 = arith.constant 0 : i32
    %c0_i32_0 = arith.constant 0 : i32
    %c0_i32_1 = arith.constant 0 : i32
    return %c0_i32, %c0_i32_0 : i32, i32
  }
  func.func @transform_2(%arg0: i32) -> (i32, i32, i32) {
    %c0_i32 = arith.constant 0 : i32
    %c0_i32_0 = arith.constant 0 : i32
    %c0_i32_1 = arith.constant 0 : i32
    return %arg0, %c0_i32, %c0_i32_0 : i32, i32, i32
  }
  func.func @transform_3(%arg0: i32) -> (i32, i32, i32) {
    %c0_i32 = arith.constant 0 : i32
    %c0_i32_0 = arith.constant 0 : i32
    %c0_i32_1 = arith.constant 0 : i32
    return %arg0, %c0_i32, %c0_i32_0 : i32, i32, i32
  }
}

</mosaic_0001>

<bundles_post_ra>
// kernel: tpu_custom_call.1
= control target key start
LH: loop header
LB: loop body
LE: loop exit
PB: predicated region body
PF: predicated region fallthrough
CT: control target
= control target key end

     0   :  { %s997_s0 = inlined_call_operand.hbm [shape: f32[10,128], index: 0, kind: input, shape index: {}]   ;;  %s998_s1 = inlined_call_operand.hbm [shape: f32[8,128], index: 1, kind: input, shape index: {}]   ;;  %s999_s2 = inlined_call_operand.hbm [shape: f32[10,7,128], index: 2, kind: input, shape index: {}]   ;;  %s1000_s3 = inlined_call_operand.hbm [shape: f32[10,16,128], index: 3, kind: output, shape index: {}]  }
   0x1   :  { %1003 = sst [smem:[#allocation13_spill]] %s998_s1 }
   0x2   :  { %8 = vsyncpa [#allocation3], 0 }
   0x3   :  { %10 = vsyncpa [#allocation3 + $0x1], 0 }
   0x4   :  { %11 = vsyncpa [#allocation6], 0 }
   0x5   :  { %12 = vsyncpa [#allocation4], 0 }
   0x6   :  { %14 = vsyncpa [#allocation4 + $0x1], 0  ;;  %s741_s12 = smov 0   ;;  %s743_s13 = smov 0  }
   0x7   :  { %s745_s14 = smov 0   ;;  %s747_s15 = smov 0  }
   0x8 LB: > { %s762_s16 = sadd.s32 4294967295, %s712_s15   ;;  %s438_s17 = sadd.s32 4294967294, %s712_s15   ;;  %s712_s15 = sphi %s747_s15, %s1019_s15   ;;  %s708_s14 = sphi %s745_s14, %s1018_s14   ;;  %s704_s13 = sphi %s743_s13, %s1017_s13   ;;  %s700_s12 = sphi %s741_s12, %s1016_s12  }
   0x9   : > { %s766_s18 = sadd.s32 1, %s712_s15   ;;  %s27_s19 = sadd.s32 1, %s708_s14 }
   0xa   : > { %s24_s20 = ssub.s32 %s712_s15, %s766_s18  ;;  %p34_p0 = scmp.ne.s32.totalorder %s708_s14, %s704_s13 }
   0xb   : > { %p25_p1 = scmp.eq.s32.totalorder %s24_s20, 0  ;;  %p35_p2 = scmp.eq.s32.totalorder %s712_s15, 0 }
   0xc   : > { %p40_p3 = scmp.ne.s32.totalorder %s704_s13, %s700_s12  ;;  %p1002_p4 = scmp.eq.s32.totalorder %s762_s16, 0 }
   0xd   : > { %s778_s21 = scalar_select %p25_p1, %s708_s14, %s27_s19  }
   0xe   : > { %p780_p5 = por %p35_p2, %p34_p0  ;;  %p786_p6 = por %p1002_p4, %p40_p3 }
   0xf   : > { %p111_p7 = scmp.eq.s32.totalorder %s762_s16, 1  ;;  %p117_p8 = scmp.eq.s32.totalorder %s438_s17, 1 }
  0x10   : > { %p439_p9 = scmp.ge.s32.totalorder %s712_s15, 1  ;;  %p124_p10 = scmp.lt.s32.totalorder %s712_s15, 3 }
  0x11   : > { %p793_p11 = por %p111_p7, %p34_p0  ;;  %p797_p12 = por %p117_p8, %p40_p3 }
  0x12   : > { %p801_p13 = pnand %p439_p9, %p124_p10  ;;  %s1009_s1 = sld [smem:[#allocation13_spill]] }
  0x13   : > { %s1007_s25 = scalar_select %p797_p12, 1, 0 }
  0x14   : > { %p482_p1 = pneg %p801_p13  ;;  %s714_s30 = smov [#allocation5]  }
  0x15   : > { %s138_s4 = sshll.u32 %s714_s30, 4  ;;  %p1001_p2 = scmp.ge.s32.totalorder %s712_s15, 2  ;;  %s139_s4 = int_to_ptr.vmem [resolvable:$true] %s138_s4 }
  0x16   : > { %p483_p0 = pnand %p482_p1, %p1002_p4  ;;  %s149_s5 = sand.u32 (!%p1001_p2), 1, %s712_s15  }
  0x17   : > { %145 = sbr.rel (%p1001_p2) target bundleno = 77 (0x4d), region = 20  ;;  %s151_s6 = sand.u32 (!%p1001_p2), 1, %s708_s14  }
  0x18   : > { %s136_s29 = sshll.u32 %s1009_s1, 4  ;;  %s442_s7 = sshll.u32 (!%p1001_p2), %s151_s6, 3  ;;  %s137_s29 = int_to_ptr.hbm [resolvable:$true] %s136_s29 }
  0x19   : > { %485 = dma.hbm_to_vmem [thread:$0]  (!%p483_p0), %s137_s29, 128, %s139_s4, [#allocation6]  }
  0x1a   : > { %s443_s8 = sshll.u32 (!%p1001_p2), %s712_s15, 3  ;;  %s153_s17 = scalar_lea.vmem (!%p1001_p2), [#allocation2], %s442_s7 }
  0x1b   : > { %s157_s11 = scalar_lea.hbm (!%p1001_p2), %s997_s0, %s443_s8  ;;  %s161_s19 = sshll.u32 (!%p1001_p2), %s153_s17, 4  ;;  %s162_s19 = int_to_ptr.vmem [resolvable:$true] %s161_s19 }
  0x1c   : > { %s159_s20 = sshll.u32 %s157_s11, 4  ;;  %s821_s27 = scalar_lea.sflag [#allocation3], %s149_s5  ;;  %s160_s20 = int_to_ptr.hbm [resolvable:$true] %s159_s20 }
  0x1d   : > { %s560_s28 = sshra.s32 %s160_s20, 4  ;;  %s566_s1 = scalar_lea.hbm %s997_s0, 16  ;;  %s561_s28 = int_to_ptr.hbm [resolvable:$true] %s560_s28 }
  0x1e   : > { %s562_s29 = scalar_lea.hbm %s561_s28, 8  ;;  %p567_p9 = scmp.lt.s32.totalorder %s561_s28, %s997_s0 }
  0x1f   : > { %p563_p3 = scmp.ne.s32.totalorder %s561_s28, %s562_s29  ;;  %p568_p10 = scmp.lt.s32.totalorder %s566_s1, %s562_s29 }
  0x21   : > { %p564_p7 = pnand %p563_p3, %p780_p5  ;;  %p569_p1 = por %p568_p10, %p567_p9 }
  0x23   : > { %p565_p8 = pneg %p564_p7 }
  0x25   : > { %p570_p0 = pnand %p569_p1, %p565_p8 }
  0x27   : > { %573 = shalt.err (!%p570_p0)
}
  0x28   : > { %476 = dma.hbm_to_vmem [thread:$0]  (%p780_p5), %s160_s20, 128, %s162_s19, %s821_s27  }
  0x29   : > { %167 = sbr.rel (!%p780_p5) target bundleno = 77 (0x4d), region = 28  ;;  %s444_s5 = sshll.u32 (%p780_p5), %s151_s6, 6 }
  0x2a   : > { %s174_s7 = ssub.s32 (%p780_p5), 10, %s443_s8  ;;  %s172_s28 = scalar_lea.vmem (%p780_p5), [#allocation7], %s444_s5 }
  0x2b   : > { %p175_p3 = scmp.lt.s32.totalorder (%p780_p5), %s174_s7, 8 }
  0x2e   : > { %s1021_s7 = smov (!%p175_p3, %s174_s7), 8 }
  0x2f   : > { %s446_s11 = sshll.u32 %s1021_s7, 3 }
  0x30   : > { %s178_s17 = ssub.s32 64, %s446_s11 }
  0x31   : > { %s179_s1 = sshll.u32 %s178_s17, 4 }
  0x32   : > { %180 = vsyncadd %s821_s27, %s179_s1  ;;  %p840_p7 = scmp.ne.s32.totalorder %s446_s11, 0  ;;  %s468_s22 = sshll.u32 %s712_s15, 6 }
  0x33   : > { %s183_s20 = scalar_lea.hbm %s999_s2, %s468_s22  ;;  %s848_s29 = sshll.u32 %s172_s28, 4  ;;  %s188_s29 = int_to_ptr.vmem [resolvable:$true] %s848_s29 }
  0x34   : > { %s185_s30 = sshll.u32 %s183_s20, 4  ;;  %s450_s4 = sshll.u32 %s1021_s7, 7  ;;  %s851_s30 = int_to_ptr.hbm [resolvable:$true] %s185_s30 }
  0x35   : > { %s588_s9 = sshra.s32 %s851_s30, 4  ;;  %s590_s10 = sshrl.u32 %s450_s4, 4  ;;  %s589_s9 = int_to_ptr.hbm [resolvable:$true] %s588_s9 }
  0x36   : > { %s595_s5 = scalar_lea.hbm %s589_s9, %s590_s10  ;;  %s599_s1 = scalar_lea.hbm %s999_s2, 80 }
  0x37   : > { %p596_p5 = scmp.ne.s32.totalorder %s589_s9, %s595_s5  ;;  %p600_p10 = scmp.lt.s32.totalorder %s589_s9, %s999_s2 }
  0x38   : > { %p601_p1 = scmp.lt.s32.totalorder %s599_s1, %s595_s5 }
  0x39   : > { %p597_p8 = pnand %p596_p5, %p840_p7 }
  0x3a   : > { %p602_p0 = por %p601_p1, %p600_p10 }
  0x3b   : > { %p598_p9 = pneg %p597_p8 }
  0x3d   : > { %p603_p3 = pnand %p602_p0, %p598_p9 }
  0x3f   : > { %606 = shalt.err (!%p603_p3)
}
  0x40   : > { %s607_s6 = sshra.s32 %s188_s29, 4  ;;  %s715_s20 = smov [#allocation7]   ;;  %s608_s6 = int_to_ptr.vmem [resolvable:$true] %s607_s6 }
  0x41   : > { %s614_s8 = scalar_lea.vmem %s608_s6, %s590_s10  ;;  %s618_s11 = scalar_lea.vmem %s715_s20, 128 }
  0x42   : > { %p615_p5 = scmp.ne.s32.totalorder %s608_s6, %s614_s8  ;;  %p620_p4 = scmp.lt.s32.totalorder %s618_s11, %s614_s8 }
  0x44   : > { %p616_p8 = pnand %p615_p5, %p840_p7 }
  0x46   : > { %p617_p2 = pneg %p616_p8 }
  0x48   : > { %p622_p12 = pnand %p620_p4, %p617_p2 }
  0x4a   : > { %625 = shalt.err (!%p622_p12)
}
  0x4b   : > { %s716_s9 = smov 128   ;;  %s717_s5 = smov 8  }
  0x4c   : > { %193 = dma.hbm_to_vmem [thread:$0]  (%p840_p7), %s851_s30, %s450_s4, %s188_s29, %s821_s27, %s716_s9, %s716_s9, %s717_s5  }
  0x4d PF: > { %199 = sbr.rel (%p801_p13) target bundleno = 146 (0x92), region = 32  ;;  %s201_s10 = sand.u32 (!%p801_p13), 1, %s762_s16  }
  0x4e   : > { %s881_s17 = sand.u32 (!%p801_p13), 1, %s704_s13   ;;  %s202_s28 = scalar_lea.sflag (!%p801_p13), [#allocation3], %s201_s10 }
  0x4f   : > { %s452_s1 = sshll.u32 (!%p801_p13), %s881_s17, 3 }
  0x50   : > { %s205_s22 = scalar_lea.vmem (!%p801_p13), [#allocation2], %s452_s1 }
  0x52   : > { %683 = dma.done.wait (%p786_p6), %s202_s28, 128  }
  0x53   : > { %685 = vsyncadd (%p786_p6), %s202_s28, 4294967168  ;;  %p1011_p4 = scmp.eq.s32.totalorder %s762_s16, 0 }
  0x55   : > { %687 = dma.done.wait (%p1011_p4), [#allocation6], 128   ;;  %p1012_p12 = pmov %p1011_p4 }
  0x56   : > { %s454_s26 = sshll.u32 %s881_s17, 6 }
  0x57   : > { %689 = vsyncadd (%p1012_p12), [#allocation6], 4294967168  ;;  %s893_s27 = scalar_lea.vmem [#allocation7], %s454_s26 }
  0x58   : > { %691 = dma.done.wait (%p786_p6), %s202_s28, 1024  }
  0x59   : > { %693 = vsyncadd (%p786_p6), %s202_s28, 4294966272  ;;  %s455_s7 = sshll.u32 %s881_s17, 7  ;;  %v260_v0 = vld [vmem:[%s205_s22] sm:$0xff]  ;;  %v284_v1 = vld [vmem:[#allocation5] sm:$0xff]  ;;  %s310_s23 = scalar_lea.sflag [#allocation4], %s881_s17 }
  0x5a   : > { %s900_s19 = scalar_lea.vmem [#allocation8], %s455_s7  ;;  %v262_v2 = vrot.slane %v260_v0, 1  ;;  %v263_v3 = vrot.slane %v260_v0, 2  ;;  %v264_v4 = vrot.slane %v260_v0, 3  ;;  %v265_v5 = vrot.slane %v260_v0, 4  ;;  %s457_s29 = sshll.u32 (%p793_p11), %s762_s16, 3 }
  0x5b   : > { %276 = vst [vmem:[%s900_s19] sm:$0x1] %v260_v0  ;;  %v266_v6 = vrot.slane %v260_v0, 5  ;;  %v267_v7 = vrot.slane %v260_v0, 6  ;;  %v268_v8 = vrot.slane %v260_v0, 7  ;;  %v293_v9 = vld [vmem:[%s893_s27] sm:$0x7f] }
  0x5c   : > { %285 = vst [vmem:[%s900_s19 + $0x1] sm:$0xff] %v284_v1  ;;  %v294_v10 = vld [vmem:[%s893_s27 + $0x8] sm:$0x7f]  ;;  %v295_v11 = vld [vmem:[%s893_s27 + $0x10] sm:$0x7f]  ;;  %s318_s30 = ssub.s32 (%p793_p11), 10, %s457_s29 }
  0x5d   : > { %277 = vst [vmem:[%s900_s19 + $0x10] sm:$0x1] %v262_v2  ;;  %v296_v12 = vld [vmem:[%s893_s27 + $0x18] sm:$0x7f]  ;;  %v297_v13 = vld [vmem:[%s893_s27 + $0x20] sm:$0x7f] }
  0x5e   : > { %278 = vst [vmem:[%s900_s19 + $0x20] sm:$0x1] %v263_v3  ;;  %v298_v14 = vld [vmem:[%s893_s27 + $0x28] sm:$0x7f]  ;;  %v299_v15 = vld [vmem:[%s893_s27 + $0x30] sm:$0x7f] }
  0x5f   : > { %279 = vst [vmem:[%s900_s19 + $0x30] sm:$0x1] %v264_v4  ;;  %v300_v16 = vld [vmem:[%s893_s27 + $0x38] sm:$0x7f]  ;;  %p319_p6 = scmp.lt.s32.totalorder (%p793_p11), %s318_s30, 8 }
  0x60   : > { %280 = vst [vmem:[%s900_s19 + $0x40] sm:$0x1] %v265_v5 }
  0x61   : > { %281 = vst [vmem:[%s900_s19 + $0x50] sm:$0x1] %v266_v6 }
  0x62   : > { %282 = vst [vmem:[%s900_s19 + $0x60] sm:$0x1] %v267_v7 }
  0x63   : > { %283 = vst [vmem:[%s900_s19 + $0x70] sm:$0x1] %v268_v8 }
  0x64   : > { %286 = vst [vmem:[%s900_s19 + $0x11] sm:$0xff] %v284_v1 }
  0x65   : > { %287 = vst [vmem:[%s900_s19 + $0x21] sm:$0xff] %v284_v1 }
  0x66   : > { %288 = vst [vmem:[%s900_s19 + $0x31] sm:$0xff] %v284_v1 }
  0x67   : > { %289 = vst [vmem:[%s900_s19 + $0x41] sm:$0xff] %v284_v1 }
  0x68   : > { %290 = vst [vmem:[%s900_s19 + $0x51] sm:$0xff] %v284_v1 }
  0x69   : > { %291 = vst [vmem:[%s900_s19 + $0x61] sm:$0xff] %v284_v1 }
  0x6a   : > { %292 = vst [vmem:[%s900_s19 + $0x71] sm:$0xff] %v284_v1 }
  0x6b   : > { %301 = vst [vmem:[%s900_s19 + $0x9] sm:$0x7f] %v293_v9 }
  0x6c   : > { %302 = vst [vmem:[%s900_s19 + $0x19] sm:$0x7f] %v294_v10 }
  0x6d   : > { %303 = vst [vmem:[%s900_s19 + $0x29] sm:$0x7f] %v295_v11 }
  0x6e   : > { %304 = vst [vmem:[%s900_s19 + $0x39] sm:$0x7f] %v296_v12  ;;  %316 = sbr.rel (!%p793_p11) target bundleno = 146 (0x92), region = 48 }
  0x6f   : > { %305 = vst [vmem:[%s900_s19 + $0x49] sm:$0x7f] %v297_v13 }
  0x70   : > { %306 = vst [vmem:[%s900_s19 + $0x59] sm:$0x7f] %v298_v14 }
  0x71   : > { %307 = vst [vmem:[%s900_s19 + $0x69] sm:$0x7f] %v299_v15 }
  0x72   : > { %308 = vst [vmem:[%s900_s19 + $0x79] sm:$0x7f] %v300_v16 }
  0x73   : > { %s1023_s30 = smov (!%p319_p6, %s318_s30), 8 }
  0x74   : > { %s469_s4 = sshll.u32 %s1023_s30, 4 }
  0x75   : > { %s323_s6 = ssub.s32 128, %s469_s4 }
  0x76   : > { %s324_s8 = sshll.u32 %s323_s6, 4 }
  0x77   : > { %325 = vsyncadd %s310_s23, %s324_s8  ;;  %p943_p13 = scmp.ne.s32.totalorder %s469_s4, 0  ;;  %s471_s20 = sshll.u32 %s762_s16, 7 }
  0x78   : > { %s329_s5 = scalar_lea.hbm %s1000_s3, %s471_s20  ;;  %s332_s10 = sshll.u32 %s900_s19, 4  ;;  %s952_s10 = int_to_ptr.vmem [resolvable:$true] %s332_s10 }
  0x79   : > { %s334_s1 = sshll.u32 %s329_s5, 4  ;;  %s473_s28 = sshll.u32 %s1023_s30, 8  ;;  %s954_s1 = int_to_ptr.hbm [resolvable:$true] %s334_s1 }
  0x7a   : > { %s627_s22 = sshra.s32 %s952_s10, 4  ;;  %s629_s26 = sshrl.u32 %s473_s28, 4  ;;  %s628_s22 = int_to_ptr.vmem [resolvable:$true] %s627_s22 }
  0x7b   : > { %s634_s27 = scalar_lea.vmem %s628_s22, %s629_s26  ;;  %s718_s16 = smov [#allocation8]  }
  0x7c   : > { %p635_p11 = scmp.ne.s32.totalorder %s628_s22, %s634_s27  ;;  %s638_s7 = scalar_lea.vmem %s718_s16, 256 }
  0x7d   : > { %p640_p9 = scmp.lt.s32.totalorder %s638_s7, %s634_s27 }
  0x7e   : > { %p636_p2 = pnand %p635_p11, %p943_p13 }
  0x80   : > { %p637_p7 = pneg %p636_p2 }
  0x82   : > { %p642_p10 = pnand %p640_p9, %p637_p7 }
  0x84   : > { %645 = shalt.err (!%p642_p10)
}
  0x85   : > { %s646_s19 = sshra.s32 %s954_s1, 4  ;;  %s657_s8 = scalar_lea.hbm %s1000_s3, 160  ;;  %s647_s19 = int_to_ptr.hbm [resolvable:$true] %s646_s19 }
  0x86   : > { %s653_s29 = scalar_lea.hbm %s647_s19, %s629_s26  ;;  %p658_p5 = scmp.lt.s32.totalorder %s647_s19, %s1000_s3 }
  0x87   : > { %p654_p1 = scmp.ne.s32.totalorder %s647_s19, %s653_s29  ;;  %p659_p8 = scmp.lt.s32.totalorder %s657_s8, %s653_s29 }
  0x89   : > { %p655_p0 = pnand %p654_p1, %p943_p13  ;;  %p660_p4 = por %p659_p8, %p658_p5 }
  0x8b   : > { %p656_p3 = pneg %p655_p0 }
  0x8d   : > { %p661_p12 = pnand %p660_p4, %p656_p3 }
  0x8f   : > { %664 = shalt.err (!%p661_p12)
}
  0x90   : > { %s719_s9 = smov 128   ;;  %s720_s5 = smov 8  }
  0x91   : > { %340 = dma.vmem_to_hbm [thread:$0]  (%p943_p13), %s952_s10, %s473_s28, %s954_s1, %s310_s23, %s719_s9, %s719_s9, %s720_s5  }
  0x92 PF: > { %s349_s22 = sand.u32 1, %s700_s12   ;;  %p1014_p6 = scmp.ne.s32.totalorder %s1007_s25, 0 }
  0x93   : > { %p1015_p11 = scmp.ge.s32.totalorder %s712_s15, 2  ;;  %s350_s26 = scalar_lea.sflag [#allocation4], %s349_s22 }
  0x95   : > { %p487_p2 = pnand %p1015_p11, %p1014_p6 }
  0x97   : > { %p488_p7 = pneg %p487_p2 }
  0x99   : > { %695 = dma.done.wait (%p488_p7), %s350_s26, 2048  }
  0x9a   : > { %697 = vsyncadd (%p488_p7), %s350_s26, 4294965248  ;;  %p17_p9 = scmp.ge.s32.totalorder %s766_s18, 4   ;;  %s1016_s12 = smov %s704_s13 }
  0x9b   : > { %s1017_s13 = smov %s708_s14  ;;  %s1018_s14 = smov %s778_s21 }
  0x9c   : > { %s1019_s15 = smov %s766_s18  ;;  %19 = sbr.rel (!%p17_p9) target bundleno = 8 (0x8), region = 92 }
  0xa1   :  { %356 = vsyncpa [#allocation3], 1 }
  0xa2   :  { %358 = vsyncpa [#allocation3 + $0x1], 1 }
  0xa3   :  { %359 = vsyncpa [#allocation6], 1 }
  0xa4   :  { %360 = vsyncpa [#allocation4], 1 }
  0xa5   :  { %362 = vsyncpa [#allocation4 + $0x1], 1 }

</bundles_post_ra>
